<compile_context>
chip_gen: v6e
topology: v6e:2x2x1
jax: 0.10.0
libtpu: 0.0.40
codegen_flags: <defaults>
</compile_context>

<pallas_src>
import functools

import jax
import jax.numpy as jnp
from jax.experimental import pallas as pl
from jax.experimental.pallas import tpu as pltpu


def _softmax_tree_kernel(s_ref, gamma_ref, eta_ref, w_ref, b_ref,
                         yhat_ref, lamb_ref):
    # s_ref:     (V*L, tile)  transposed softmax-structure (leaves on lanes)
    # gamma_ref: (L, tile)
    # eta_ref:   (L, tile)
    # w_ref:     (L, V)   w_ref[l, v] == linear_list[l].weight[0, v]
    # b_ref:     (L, 1)   b_ref[l, 0] == linear_list[l].bias[0]
    # yhat_ref:  (1, tile)
    # lamb_ref:  (L, tile)
    L, V = w_ref.shape
    w = w_ref[...]          # (L, V)  tiny, resident (constant index_map)
    b = b_ref[...]          # (L, 1)

    # z[l, m] = sum_v S[v*L + l, m] * w[l, v] + b[l]
    # V unrolled multiply-adds over sublane-aligned (L, tile) slices (VPU).
    z = s_ref[pl.ds(0, L), :] * w[:, 0:1] + b
    for v in range(1, V):
        z = z + s_ref[pl.ds(v * L, L), :] * w[:, v:v + 1]

    # softmax over the lamb axis (sublane axis) == torch.nn.Softmax(dim=2)
    z = z - jnp.max(z, axis=0, keepdims=True)
    e = jnp.exp(z)
    denom = jnp.sum(e, axis=0, keepdims=True)                # (1, tile)
    lamb = e * pl.reciprocal(denom, approx=True)             # (L, tile)

    gamma_fill = gamma_ref[...] * lamb
    eta_fill = eta_ref[...] * lamb
    num = jnp.sum(gamma_fill, axis=0, keepdims=True)         # (1, tile)
    den = jnp.sum(eta_fill, axis=0, keepdims=True)           # (1, tile)

    yhat_ref[...] = num * pl.reciprocal(den, approx=True)
    lamb_ref[...] = lamb


@functools.partial(jax.jit, static_argnames=("tile_m",))
def softmax_tree_fit_forward(x, W, bias, *, tile_m=8192):
    """Pallas forward for SoftmaxTreeFit.

    x = (y_item, Gamma_item, eta_item, weights_item, softmax_structure_item)
      y_item:            [B, N]            (unused in forward, kept for fidelity)
      Gamma_item:        [B, N, lamb_dim]
      eta_item:          [B, N, lamb_dim]
      weights_item:      [B, N]
      softmax_structure: [B, N, num_vars*lamb_dim]  (col = var*lamb_dim + lamb)
    W:    [num_vars, lamb_dim]   (W[v, l] == linear_list[l].weight[0, v])
    bias: [lamb_dim]             (bias[l] == linear_list[l].bias[0])
    """
    _y_item, Gamma, eta, weights, softmax_structure = x
    B, N, VL = softmax_structure.shape
    V, L = W.shape
    assert VL == V * L
    M = B * N

    # --- layout plumbing (one fused XLA transpose each way, under jit) ------
    S_T = softmax_structure.reshape(M, VL).astype(jnp.float32).T   # (V*L, M)
    G_T = Gamma.reshape(M, L).astype(jnp.float32).T                # (L, M)
    E_T = eta.reshape(M, L).astype(jnp.float32).T                  # (L, M)
    W_T = W.astype(jnp.float32).T                                  # (L, V)
    b_col = bias.astype(jnp.float32).reshape(L, 1)                 # (L, 1)

    # Lane tile: multiple of 128, capped at the (lane-rounded) problem size.
    tile = min(int(tile_m), pl.cdiv(M, 128) * 128)
    tile = max(128, (tile // 128) * 128)
    M_pad = pl.cdiv(M, tile) * tile
    pad = M_pad - M
    if pad:
        S_T = jnp.pad(S_T, ((0, 0), (0, pad)))
        G_T = jnp.pad(G_T, ((0, 0), (0, pad)))
        # eta padded with 1.0 so padded lanes stay finite (they are discarded).
        E_T = jnp.pad(E_T, ((0, 0), (0, pad)), constant_values=1.0)

    grid = (M_pad // tile,)

    yhat_t, lamb_t = pl.pallas_call(
        _softmax_tree_kernel,
        out_shape=(jax.ShapeDtypeStruct((1, M_pad), jnp.float32),
                   jax.ShapeDtypeStruct((L, M_pad), jnp.float32)),
        grid_spec=pltpu.PrefetchScalarGridSpec(
            num_scalar_prefetch=0,
            grid=grid,
            in_specs=[
                pl.BlockSpec((VL, tile), lambda i: (0, i)),
                pl.BlockSpec((L, tile), lambda i: (0, i)),
                pl.BlockSpec((L, tile), lambda i: (0, i)),
                pl.BlockSpec((L, V), lambda i: (0, 0)),   # resident across steps
                pl.BlockSpec((L, 1), lambda i: (0, 0)),   # resident across steps
            ],
            out_specs=(
                pl.BlockSpec((1, tile), lambda i: (0, i)),
                pl.BlockSpec((L, tile), lambda i: (0, i)),
            ),
        ),
        compiler_params=pltpu.CompilerParams(
            dimension_semantics=("parallel",)),
    )(S_T, G_T, E_T, W_T, b_col)

    yhat_item = yhat_t[0, :M].reshape(B, N, 1)
    lamb_out = lamb_t[:, :M].T.reshape(B, N, L, 1)
    return yhat_item, weights, lamb_out


def _reference_forward(x, W, bias):
    """Plain-JAX reference mirroring the PyTorch forward, for validation."""
    _y, Gamma, eta, weights, S = x
    B, N, VL = S.shape
    V, L = W.shape
    S4 = S.reshape(B, N, V, L).astype(jnp.float32)
    z = jnp.einsum("bnvl,vl->bnl", S4, W.astype(jnp.float32)) + bias.astype(jnp.float32)
    lamb = jax.nn.softmax(z, axis=2)                       # [B, N, L]
    Gf = Gamma.reshape(B, N, L).astype(jnp.float32) * lamb
    Ef = eta.reshape(B, N, L).astype(jnp.float32) * lamb
    yhat = (Gf.sum(axis=2) / Ef.sum(axis=2))[..., None]    # [B, N, 1]
    return yhat, weights, lamb[..., None]


def _make_inputs(key, B, N, num_vars, lamb_dim):
    k_w, k_b, k_s, k_g, k_e, k_y, k_wt = jax.random.split(key, 7)
    bound = 1.0 / jnp.sqrt(num_vars)
    W = jax.random.uniform(k_w, (num_vars, lamb_dim), jnp.float32, -bound, bound)
    bias = jax.random.uniform(k_b, (lamb_dim,), jnp.float32, -bound, bound)
    softmax_structure = jax.random.uniform(
        k_s, (B, N, num_vars * lamb_dim), jnp.float32, 0.0, 1.0)
    Gamma = jax.random.uniform(k_g, (B, N, lamb_dim), jnp.float32, 0.0, 2.0)
    eta = jax.random.uniform(k_e, (B, N, lamb_dim), jnp.float32, 0.5, 2.0)
    y_item = jax.random.uniform(k_y, (B, N), jnp.float32)
    weights_item = jax.random.uniform(k_wt, (B, N), jnp.float32, 0.0, 1.0)
    return (y_item, Gamma, eta, weights_item, softmax_structure), W, bias


if __name__ == "__main__":
    num_vars, lamb_dim = 4, 8
    key = jax.random.PRNGKey(0)
    k0, k1 = jax.random.split(key)

    # Case 1: small, deterministic shapes (M = 128 -> single grid step,
    # default tile capped to the problem size).
    x, W, bias = _make_inputs(k0, B=2, N=64, num_vars=num_vars, lamb_dim=lamb_dim)
    yhat, w_out, lamb = softmax_tree_fit_forward(x, W, bias)
    jax.block_until_ready((yhat, w_out, lamb))
    yhat_ref, _, lamb_ref = _reference_forward(x, W, bias)
    # Tolerances relaxed vs. exact divide: pl.reciprocal(approx=True) uses the
    # EUP's approximate reciprocal.
    assert yhat.shape == (2, 64, 1) and lamb.shape == (2, 64, lamb_dim, 1)
    assert jnp.allclose(yhat, yhat_ref, atol=5e-3, rtol=5e-3)
    assert jnp.allclose(lamb, lamb_ref, atol=5e-3, rtol=5e-3)

    # Case 2: ragged M (B*N = 300, not a multiple of 128) with a small tile to
    # exercise padding and a multi-step 'parallel' grid.
    x2, W2, bias2 = _make_inputs(k1, B=3, N=100, num_vars=num_vars, lamb_dim=lamb_dim)
    yhat2, _, lamb2 = softmax_tree_fit_forward(x2, W2, bias2, tile_m=128)
    jax.block_until_ready((yhat2, lamb2))
    yhat2_ref, _, lamb2_ref = _reference_forward(x2, W2, bias2)
    assert jnp.allclose(yhat2, yhat2_ref, atol=5e-3, rtol=5e-3)
    assert jnp.allclose(lamb2, lamb2_ref, atol=5e-3, rtol=5e-3)

    print("KERNEL_OK")
</pallas_src>

<mosaic_0001>
module attributes {stable_mosaic.version = 11 : i64} {
  func.func @_softmax_tree_kernel(%arg0: i32, %arg1: memref<32x128xf32, #tpu.memory_space<vmem>>, %arg2: memref<8x128xf32, #tpu.memory_space<vmem>>, %arg3: memref<8x128xf32, #tpu.memory_space<vmem>>, %arg4: memref<8x4xf32, #tpu.memory_space<vmem>>, %arg5: memref<8x1xf32, #tpu.memory_space<vmem>>, %arg6: memref<1x128xf32, #tpu.memory_space<vmem>>, %arg7: memref<8x128xf32, #tpu.memory_space<vmem>>) attributes {dimension_semantics = [#tpu.dimension_semantics<parallel>], iteration_bounds = array<i64: 1>, scalar_prefetch = 0 : i64, scratch_operands = 0 : i64, tpu.core_type = #tpu.core_type<tc>, window_params = [{transform_indices = @transform_0, window_bounds = array<i64: 32, 128>}, {transform_indices = @transform_1, window_bounds = array<i64: 8, 128>}, {transform_indices = @transform_2, window_bounds = array<i64: 8, 128>}, {pipeline_mode = #tpu.pipeline_mode<synchronous>, transform_indices = @transform_3, window_bounds = array<i64: 8, 4>}, {pipeline_mode = #tpu.pipeline_mode<synchronous>, transform_indices = @transform_4, window_bounds = array<i64: 8, 1>}, {transform_indices = @transform_5, window_bounds = array<i64: 1, 128>}, {transform_indices = @transform_6, window_bounds = array<i64: 8, 128>}]} {
    %c0 = arith.constant 0 : index
    %c0_0 = arith.constant 0 : index
    %0 = vector.load %arg4[%c0, %c0_0] : memref<8x4xf32, #tpu.memory_space<vmem>>, vector<8x4xf32>
    %c0_1 = arith.constant 0 : index
    %c0_2 = arith.constant 0 : index
    %1 = vector.load %arg5[%c0_1, %c0_2] : memref<8x1xf32, #tpu.memory_space<vmem>>, vector<8x1xf32>
    %c0_3 = arith.constant 0 : index
    %c0_4 = arith.constant 0 : index
    %2 = vector.load %arg1[%c0_3, %c0_4] : memref<32x128xf32, #tpu.memory_space<vmem>>, vector<8x128xf32>
    %3 = vector.extract_strided_slice %0 {offsets = [0, 0], sizes = [8, 1], strides = [1, 1]} : vector<8x4xf32> to vector<8x1xf32>
    %4 = vector.broadcast %3 : vector<8x1xf32> to vector<8x128xf32>
    %5 = arith.mulf %2, %4 : vector<8x128xf32>
    %6 = vector.broadcast %1 : vector<8x1xf32> to vector<8x128xf32>
    %7 = arith.addf %5, %6 : vector<8x128xf32>
    %c8 = arith.constant 8 : index
    %c0_5 = arith.constant 0 : index
    %8 = vector.load %arg1[%c8, %c0_5] : memref<32x128xf32, #tpu.memory_space<vmem>>, vector<8x128xf32>
    %9 = vector.extract_strided_slice %0 {offsets = [0, 1], sizes = [8, 1], strides = [1, 1]} : vector<8x4xf32> to vector<8x1xf32>
    %10 = vector.broadcast %9 : vector<8x1xf32> to vector<8x128xf32>
    %11 = arith.mulf %8, %10 : vector<8x128xf32>
    %12 = arith.addf %7, %11 : vector<8x128xf32>
    %c16 = arith.constant 16 : index
    %c0_6 = arith.constant 0 : index
    %13 = vector.load %arg1[%c16, %c0_6] : memref<32x128xf32, #tpu.memory_space<vmem>>, vector<8x128xf32>
    %14 = vector.extract_strided_slice %0 {offsets = [0, 2], sizes = [8, 1], strides = [1, 1]} : vector<8x4xf32> to vector<8x1xf32>
    %15 = vector.broadcast %14 : vector<8x1xf32> to vector<8x128xf32>
    %16 = arith.mulf %13, %15 : vector<8x128xf32>
    %17 = arith.addf %12, %16 : vector<8x128xf32>
    %c24 = arith.constant 24 : index
    %c0_7 = arith.constant 0 : index
    %18 = vector.load %arg1[%c24, %c0_7] : memref<32x128xf32, #tpu.memory_space<vmem>>, vector<8x128xf32>
    %19 = vector.extract_strided_slice %0 {offsets = [0, 3], sizes = [8, 1], strides = [1, 1]} : vector<8x4xf32> to vector<8x1xf32>
    %20 = vector.broadcast %19 : vector<8x1xf32> to vector<8x128xf32>
    %21 = arith.mulf %18, %20 : vector<8x128xf32>
    %22 = arith.addf %17, %21 : vector<8x128xf32>
    %cst = arith.constant dense<0xFF800000> : vector<128xf32>
    %23 = vector.multi_reduction <maximumf>, %22, %cst [0] : vector<8x128xf32> to vector<128xf32>
    %24 = vector.shape_cast %23 : vector<128xf32> to vector<1x128xf32>
    %25 = vector.broadcast %24 : vector<1x128xf32> to vector<8x128xf32>
    %26 = arith.subf %22, %25 : vector<8x128xf32>
    %27 = math.exp %26 : vector<8x128xf32>
    %cst_8 = arith.constant dense<0.000000e+00> : vector<128xf32>
    %28 = vector.multi_reduction <add>, %27, %cst_8 [0] : vector<8x128xf32> to vector<128xf32>
    %29 = vector.shape_cast %28 : vector<128xf32> to vector<1x128xf32>
    %30 = tpu.reciprocal %29 {approx = true} : vector<1x128xf32> -> vector<1x128xf32>
    %31 = vector.broadcast %30 : vector<1x128xf32> to vector<8x128xf32>
    %32 = arith.mulf %27, %31 : vector<8x128xf32>
    %c0_9 = arith.constant 0 : index
    %c0_10 = arith.constant 0 : index
    %33 = vector.load %arg2[%c0_9, %c0_10] : memref<8x128xf32, #tpu.memory_space<vmem>>, vector<8x128xf32>
    %34 = arith.mulf %33, %32 : vector<8x128xf32>
    %c0_11 = arith.constant 0 : index
    %c0_12 = arith.constant 0 : index
    %35 = vector.load %arg3[%c0_11, %c0_12] : memref<8x128xf32, #tpu.memory_space<vmem>>, vector<8x128xf32>
    %36 = arith.mulf %35, %32 : vector<8x128xf32>
    %cst_13 = arith.constant dense<0.000000e+00> : vector<128xf32>
    %37 = vector.multi_reduction <add>, %34, %cst_13 [0] : vector<8x128xf32> to vector<128xf32>
    %38 = vector.shape_cast %37 : vector<128xf32> to vector<1x128xf32>
    %cst_14 = arith.constant dense<0.000000e+00> : vector<128xf32>
    %39 = vector.multi_reduction <add>, %36, %cst_14 [0] : vector<8x128xf32> to vector<128xf32>
    %40 = vector.shape_cast %39 : vector<128xf32> to vector<1x128xf32>
    %41 = tpu.reciprocal %40 {approx = true} : vector<1x128xf32> -> vector<1x128xf32>
    %42 = arith.mulf %38, %41 : vector<1x128xf32>
    %c0_15 = arith.constant 0 : index
    %c0_16 = arith.constant 0 : index
    %43 = vector.load %arg6[%c0_15, %c0_16] : memref<1x128xf32, #tpu.memory_space<vmem>>, vector<1x128xf32>
    tpu.vector_store %arg6[%c0_15, %c0_16], %42 {strides = array<i32>} : memref<1x128xf32, #tpu.memory_space<vmem>>, vector<1x128xf32>,
    %c0_17 = arith.constant 0 : index
    %c0_18 = arith.constant 0 : index
    %44 = vector.load %arg7[%c0_17, %c0_18] : memref<8x128xf32, #tpu.memory_space<vmem>>, vector<8x128xf32>
    tpu.vector_store %arg7[%c0_17, %c0_18], %32 {strides = array<i32>} : memref<8x128xf32, #tpu.memory_space<vmem>>, vector<8x128xf32>,
    return
  }
  func.func @transform_0(%arg0: i32) -> (i32, i32) {
    %c0_i32 = arith.constant 0 : i32
    %c0_i32_0 = arith.constant 0 : i32
    return %c0_i32, %arg0 : i32, i32
  }
  func.func @transform_1(%arg0: i32) -> (i32, i32) {
    %c0_i32 = arith.constant 0 : i32
    %c0_i32_0 = arith.constant 0 : i32
    return %c0_i32, %arg0 : i32, i32
  }
  func.func @transform_2(%arg0: i32) -> (i32, i32) {
    %c0_i32 = arith.constant 0 : i32
    %c0_i32_0 = arith.constant 0 : i32
    return %c0_i32, %arg0 : i32, i32
  }
  func.func @transform_3(%arg0: i32) -> (i32, i32) {
    %c0_i32 = arith.constant 0 : i32
    %c0_i32_0 = arith.constant 0 : i32
    %c0_i32_1 = arith.constant 0 : i32
    return %c0_i32, %c0_i32_0 : i32, i32
  }
  func.func @transform_4(%arg0: i32) -> (i32, i32) {
    %c0_i32 = arith.constant 0 : i32
    %c0_i32_0 = arith.constant 0 : i32
    %c0_i32_1 = arith.constant 0 : i32
    return %c0_i32, %c0_i32_0 : i32, i32
  }
  func.func @transform_5(%arg0: i32) -> (i32, i32) {
    %c0_i32 = arith.constant 0 : i32
    %c0_i32_0 = arith.constant 0 : i32
    return %c0_i32, %arg0 : i32, i32
  }
  func.func @transform_6(%arg0: i32) -> (i32, i32) {
    %c0_i32 = arith.constant 0 : i32
    %c0_i32_0 = arith.constant 0 : i32
    return %c0_i32, %arg0 : i32, i32
  }
}

</mosaic_0001>

<bundles_post_ra>
// kernel: squeeze.1
= control target key start
LH: loop header
LB: loop body
LE: loop exit
PB: predicated region body
PF: predicated region fallthrough
CT: control target
= control target key end

     0   :  { %s77_s0 = inlined_call_operand.vmem [shape: f32[128], index: 0, kind: input, shape index: {}]   ;;  %s78_s1 = inlined_call_operand.hbm [shape: f32[2,64,1], index: 1, kind: output, shape index: {}]  }
   0x1   :  { %v6_v0 = vld [vmem:[%s77_s0] sm:$0x1] }
   0x2   :  { %2 = vsyncpa [#allocation1], 0  ;;  %7 = vst [vmem:[#allocation3] sm:$0x1] %v6_v0  ;;  %vm9_vm0 = vcmask 523264   ;;  %s59_s0 = smov 64  }
   0x3   :  { %s60_s8 = smov [#allocation0]  }
   0x4   :  { %s29_s9 = sshll.u32 %s60_s8, 4  ;;  %s30_s9 = int_to_ptr.vmem [resolvable:$true] %s29_s9 }
   0x5   :  { %s37_s10 = scalar_lea.vmem %s30_s9, 32  ;;  %p42_p1 = scmp.lt.s32.totalorder %s30_s9, %s30_s9 }
   0x6   :  { %p38_p0 = scmp.ne.s32.totalorder %s30_s9, %s37_s10  ;;  %p43_p2 = scmp.lt.s32.totalorder %s37_s10, %s37_s10 }
   0x8   :  { %p44_p3 = por %p43_p2, %p42_p1 }
   0x9   :  { %v11_v1 = vld [vmem:[#allocation3] sm:$0x1]  }
   0xa   :  { %v8_v2 = vld [vmem:[#allocation3] sm:$0x1]   ;;  %12 = vrot.lane.b32.xlu0 %v11_v1, %s59_s0  ;;  %p45_p4 = pnand %p44_p3, %p38_p0 }
   0xb   :  { %10 = vst.msk [vmem:[#allocation2] sm:$0x1] %vm9_vm0, %v8_v2  }
  0x7c   :  { %v13_v3 = vpop.permute.xlu0 %12  }
  0x7d   :  { %16 = vst.msk [vmem:[#allocation2 + $0x1] sm:$0x1] %vm9_vm0, %v13_v3  }
  0x84   :  { %v21_v4 = vld [vmem:[#allocation2] sm:$0x3] }
  0x85   :  { %24 = vst [vmem:[#allocation0] sm:$0x3] %v21_v4 }
  0x86   :  { %48 = shalt.err (!%p45_p4)
}
  0x87   :  { %32 = dma.vmem_to_hbm [thread:$0]  %s30_s9, 32, %s78_s1, [#allocation1]  }
  0x88   :  { %57 = dma.done.wait [#allocation1], 32  }
  0x89   :  { %58 = vsyncadd [#allocation1], 4294967264 }
  0x8a   :  { %34 = vsyncpa [#allocation1], 1 }

// kernel: softmax_tree_fit_forward.1
= control target key start
LH: loop header
LB: loop body
LE: loop exit
PB: predicated region body
PF: predicated region fallthrough
CT: control target
= control target key end

     0   :  { %v117_v0 = vmov 0   ;;  %v118_v1 = vmov 1   ;;  %v119_v4 = vmov 2   ;;  %v120_v5 = vmov 3   ;;  %s186_s3 = inlined_call_operand.vmem [shape: f32[8,4], index: 3, kind: input, shape index: {}]   ;;  %s187_s4 = inlined_call_operand.vmem [shape: f32[8,1], index: 4, kind: input, shape index: {}]   ;;  %s188_s0 = inlined_call_operand.vmem [shape: f32[32,128], index: 0, kind: input, shape index: {}]   ;;  %s189_s2 = inlined_call_operand.vmem [shape: f32[8,128], index: 2, kind: input, shape index: {}]   ;;  %s190_s1 = inlined_call_operand.vmem [shape: f32[8,128], index: 1, kind: input, shape index: {}]   ;;  %s191_s6 = inlined_call_operand.vmem [shape: f32[8,128], index: 6, kind: output, shape index: {1}]   ;;  %s192_s5 = inlined_call_operand.vmem [shape: f32[1,128], index: 5, kind: output, shape index: {0}]  }
   0x1   :  { %107 = vset.pattern.permute.xlu0 %v117_v0  ;;  %108 = vset.pattern.permute.xlu1 %v118_v1  ;;  %v22_v2 = vld [vmem:[%s186_s3] sm:$0xff]  ;;  %v37_v9 = vld [vmem:[%s188_s0 + $0x8] sm:$0xff]  ;;  %v44_v11 = vld [vmem:[%s188_s0 + $0x10] sm:$0xff] }
   0x2   :  { %27 = vperm.xlu0 %107, %v22_v2   ;;  %39 = vperm.xlu1 %108, %v22_v2   ;;  %v23_v3 = vld [vmem:[%s187_s4] sm:$0xff]  ;;  %v51_v18 = vld [vmem:[%s188_s0 + $0x18] sm:$0xff] }
   0x3   :  { %v24_v7 = vld [vmem:[%s188_s0] sm:$0xff] }
   0x4   :  { %v77_v39 = vld [vmem:[%s189_s2] sm:$0xff] }
   0x5   :  { %v75_v41 = vld [vmem:[%s190_s1] sm:$0xff] }
   0x6   :  { %33 = vperm.xlu0 %107, %v23_v3   ;;  %109 = vset.pattern.permute.xlu1 %v119_v4 }
   0x7   :  { %46 = vperm.xlu1 %109, %v22_v2  }
   0xa   :  { %110 = vset.pattern.permute.xlu0 %v120_v5 }
   0xb   :  { %53 = vperm.xlu0 %110, %v22_v2  }
  0x7d   :  { %v28_v6 = vpop.permute.xlu0 %27  ;;  %v40_v8 = vpop.permute.xlu1 %39 }
  0x7e   :  { %v30_v10 = vmul.f32 %v28_v6, %v24_v7  ;;  %v42_v13 = vmul.f32 %v40_v8, %v37_v9 }
  0x81   :  { %v34_v12 = vpop.permute.xlu0 %33 }
  0x82   :  { %v36_v14 = vadd.f32 %v34_v12, %v30_v10  ;;  %v47_v15 = vpop.permute.xlu1 %46 }
  0x83   :  { %v49_v16 = vmul.f32 %v47_v15, %v44_v11 }
  0x84   :  { %v43_v17 = vadd.f32 %v42_v13, %v36_v14 }
  0x86   :  { %v50_v19 = vadd.f32 %v49_v16, %v43_v17  ;;  %v54_v20 = vpop.permute.xlu0 %53 }
  0x87   :  { %v56_v21 = vmul.f32 %v54_v20, %v51_v18 }
  0x89   :  { %v57_v22 = vadd.f32 %v56_v21, %v50_v19 }
  0x8b   :  { %v58_v23 = vrot.slane %v57_v22, 4 }
  0x8d   :  { %v59_v24 = vmax.f32 %v57_v22, %v58_v23 }
  0x8f   :  { %v60_v25 = vrot.slane %v59_v24, 2 }
  0x91   :  { %v61_v26 = vmax.f32 %v59_v24, %v60_v25 }
  0x93   :  { %v62_v27 = vrot.slane %v61_v26, 1 }
  0x95   :  { %v63_v28 = vmax.f32 %v61_v26, %v62_v27 }
  0x97   :  { %v64_v29 = vsub.f32 %v57_v22, %v63_v28 }
  0x99   :  { %v65_v30 = vmul.f32 1.442695, %v64_v29 }
  0x9b   :  { %111 = vpow2.f32 %v65_v30 }
  0xa8   :  { %v112_v31 = vpop.eup %111 }
  0xa9   :  { %v67_v32 = vrot.slane %v112_v31, 4 }
  0xab   :  { %v68_v33 = vadd.f32 %v112_v31, %v67_v32 }
  0xad   :  { %v69_v34 = vrot.slane %v68_v33, 2 }
  0xaf   :  { %v70_v35 = vadd.f32 %v69_v34, %v68_v33 }
  0xb1   :  { %v71_v36 = vrot.slane %v70_v35, 1 }
  0xb3   :  { %v72_v37 = vadd.f32 %v71_v36, %v70_v35 }
  0xb5   :  { %113 = vrcp.f32 %v72_v37 }
  0xc2   :  { %v114_v38 = vpop.eup %113 }
  0xc3   :  { %v74_v40 = vmul.f32 %v114_v38, %v112_v31 }
  0xc5   :  { %v78_v42 = vmul.f32 %v77_v39, %v74_v40  ;;  %94 = vst [vmem:[%s191_s6] sm:$0xff] %v74_v40  ;;  %v76_v43 = vmul.f32 %v75_v41, %v74_v40 }
  0xc7   :  { %v85_v44 = vrot.slane %v78_v42, 4  ;;  %v79_v46 = vrot.slane %v76_v43, 4 }
  0xc9   :  { %v86_v45 = vadd.f32 %v85_v44, %v78_v42  ;;  %v80_v49 = vadd.f32 %v79_v46, %v76_v43 }
  0xcb   :  { %v87_v47 = vrot.slane %v86_v45, 2  ;;  %v81_v52 = vrot.slane %v80_v49, 2 }
  0xcd   :  { %v88_v48 = vadd.f32 %v87_v47, %v86_v45  ;;  %v82_v53 = vadd.f32 %v81_v52, %v80_v49 }
  0xcf   :  { %v89_v50 = vrot.slane %v88_v48, 1  ;;  %v83_v54 = vrot.slane %v82_v53, 1 }
  0xd1   :  { %v90_v51 = vadd.f32 %v89_v50, %v88_v48  ;;  %v84_v55 = vadd.f32 %v83_v54, %v82_v53 }
  0xd3   :  { %115 = vrcp.f32 %v90_v51 }
  0xe0   :  { %v116_v56 = vpop.eup %115 }
  0xe1   :  { %v92_v57 = vmul.f32 %v116_v56, %v84_v55 }
  0xe3   :  { %93 = vst [vmem:[%s192_s5] sm:$0x1] %v92_v57 }

</bundles_post_ra>
